<compile_context>
chip_gen: v5e
topology: v5e:2x2
jax: 0.10.0
libtpu: 0.0.40
codegen_flags: <defaults>
</compile_context>

<pallas_src>
import functools

import jax
import jax.numpy as jnp
from jax.experimental import pallas as pl
from jax.experimental.pallas import tpu as pltpu


def _global_pool_kernel(x_ref, o_ref, acc_ref, *,
                        n_valid: int, tile_n: int, use_max: bool, ragged: bool):
    j = pl.program_id(1)
    nj = pl.num_programs(1)

    # Initialize the per-row accumulator on the first reduction step.
    @pl.when(j == 0)
    def _():
        if use_max:
            acc_ref[...] = jnp.full_like(acc_ref, -jnp.inf)
        else:
            acc_ref[...] = jnp.zeros_like(acc_ref)

    x = x_ref[...]

    # Mask out-of-range lanes of the (possibly) ragged last tile along N.
    if ragged:
        col = j * tile_n + jax.lax.broadcasted_iota(jnp.int32, x.shape, 1)
        valid = col < n_valid
        if use_max:
            x = jnp.where(valid, x, jnp.array(-jnp.inf, dtype=x.dtype))
        else:
            x = jnp.where(valid, x, jnp.zeros((), dtype=x.dtype))

    if use_max:
        part = jnp.max(x, axis=-1, keepdims=True).astype(jnp.float32)   # (TM, 1)
        acc_ref[...] = jnp.maximum(acc_ref[...], part)
    else:
        # Accumulate the row-sum in f32 regardless of input dtype (bf16-safe).
        part = jnp.sum(x, axis=-1, keepdims=True, dtype=jnp.float32)    # (TM, 1)
        acc_ref[...] = acc_ref[...] + part

    # Finalize on the last reduction step.
    @pl.when(j == nj - 1)
    def _():
        if use_max:
            o_ref[...] = acc_ref[...].astype(o_ref.dtype)
        else:
            o_ref[...] = (acc_ref[...] * (1.0 / float(n_valid))).astype(o_ref.dtype)


def global_pool(x: jax.Array, pooling_type: str = 'avg') -> jax.Array:
    """GlobalPool forward.  x is NCHW; returns (B, C, 1, 1)."""
    if pooling_type == 'max':
        use_max = True
    elif pooling_type == 'avg':
        use_max = False
    else:
        raise ValueError('Unknown type %s' % pooling_type)

    assert len(x.shape) == 4
    B, C, H, W = x.shape
    M = B * C
    N = H * W
    x2 = x.reshape(M, N)

    # Row tile: multiple of 8 (sublane) or the full extent.
    if M % 8 == 0:
        tm = min(M, 256)
    else:
        tm = M
    # Reduction tile: multiple of 128 (lane) or the full extent.
    if N % 128 == 0:
        tn = min(N, 2048)
    else:
        tn = N
    ragged = (N % tn) != 0

    grid = (pl.cdiv(M, tm), pl.cdiv(N, tn))

    kernel = functools.partial(
        _global_pool_kernel,
        n_valid=N, tile_n=tn, use_max=use_max, ragged=ragged,
    )

    out2 = pl.pallas_call(
        kernel,
        out_shape=jax.ShapeDtypeStruct((M, 1), x.dtype),
        grid=grid,
        in_specs=[pl.BlockSpec((tm, tn), lambda i, j: (i, j))],
        out_specs=pl.BlockSpec((tm, 1), lambda i, j: (i, 0)),
        scratch_shapes=[pltpu.VMEM((tm, 1), jnp.float32)],
        compiler_params=pltpu.CompilerParams(
            dimension_semantics=("parallel", "arbitrary"),
        ),
    )(x2)

    return out2.reshape(B, C, 1, 1)


if __name__ == "__main__":
    import numpy as np

    key = jax.random.PRNGKey(0)
    B, C, H, W = 2, 4, 16, 16
    x = jax.random.normal(key, (B, C, H, W), dtype=jnp.float32)

    # Average pooling.
    y_avg = jax.block_until_ready(global_pool(x, pooling_type='avg'))
    ref_avg = jnp.mean(x, axis=(2, 3), keepdims=True)
    assert y_avg.shape == (B, C, 1, 1)
    np.testing.assert_allclose(np.asarray(y_avg), np.asarray(ref_avg),
                               rtol=1e-5, atol=1e-5)

    # Max pooling.
    y_max = jax.block_until_ready(global_pool(x, pooling_type='max'))
    ref_max = jnp.max(x, axis=(2, 3), keepdims=True)
    assert y_max.shape == (B, C, 1, 1)
    np.testing.assert_allclose(np.asarray(y_max), np.asarray(ref_max),
                               rtol=1e-6, atol=1e-6)

    print("KERNEL_OK")
</pallas_src>

<mosaic_0001>
module attributes {stable_mosaic.version = 11 : i64} {
  func.func @_global_pool_kernel(%arg0: i32, %arg1: i32, %arg2: memref<8x256xf32, #tpu.memory_space<vmem>>, %arg3: memref<8x1xf32, #tpu.memory_space<vmem>>, %arg4: memref<8x1xf32, #tpu.memory_space<vmem>>) attributes {dimension_semantics = [#tpu.dimension_semantics<parallel>, #tpu.dimension_semantics<arbitrary>], iteration_bounds = array<i64: 1, 1>, scalar_prefetch = 0 : i64, scratch_operands = 1 : i64, tpu.core_type = #tpu.core_type<tc>, window_params = [{transform_indices = @transform_0, window_bounds = array<i64: 8, 256>}, {transform_indices = @transform_1, window_bounds = array<i64: 8, 1>}]} {
    %c0_i32 = arith.constant 0 : i32
    %0 = arith.cmpi eq, %arg1, %c0_i32 : i32
    %1 = arith.extui %0 : i1 to i32
    %c0_i32_0 = arith.constant 0 : i32
    %2 = arith.cmpi ne, %1, %c0_i32_0 : i32
    scf.if %2 {
      %cst_8 = arith.constant 0.000000e+00 : f32
      %12 = vector.broadcast %cst_8 : f32 to vector<8x1xf32>
      %c0_9 = arith.constant 0 : index
      %c0_10 = arith.constant 0 : index
      %13 = vector.load %arg4[%c0_9, %c0_10] : memref<8x1xf32, #tpu.memory_space<vmem>>, vector<8x1xf32>
      tpu.vector_store %arg4[%c0_9, %c0_10], %12 {strides = array<i32>} : memref<8x1xf32, #tpu.memory_space<vmem>>, vector<8x1xf32>,
    } else {
    }
    %c0 = arith.constant 0 : index
    %c0_1 = arith.constant 0 : index
    %3 = vector.load %arg2[%c0, %c0_1] : memref<8x256xf32, #tpu.memory_space<vmem>>, vector<8x256xf32>
    %cst = arith.constant dense<0.000000e+00> : vector<8xf32>
    %4 = vector.multi_reduction <add>, %3, %cst [1] : vector<8x256xf32> to vector<8xf32>
    %5 = vector.shape_cast %4 : vector<8xf32> to vector<8x1xf32>
    %c0_2 = arith.constant 0 : index
    %c0_3 = arith.constant 0 : index
    %6 = vector.load %arg4[%c0_2, %c0_3] : memref<8x1xf32, #tpu.memory_space<vmem>>, vector<8x1xf32>
    %7 = arith.addf %6, %5 : vector<8x1xf32>
    %c0_4 = arith.constant 0 : index
    %c0_5 = arith.constant 0 : index
    %8 = vector.load %arg4[%c0_4, %c0_5] : memref<8x1xf32, #tpu.memory_space<vmem>>, vector<8x1xf32>
    tpu.vector_store %arg4[%c0_4, %c0_5], %7 {strides = array<i32>} : memref<8x1xf32, #tpu.memory_space<vmem>>, vector<8x1xf32>,
    %c0_i32_6 = arith.constant 0 : i32
    %9 = arith.cmpi eq, %arg1, %c0_i32_6 : i32
    %10 = arith.extui %9 : i1 to i32
    %c0_i32_7 = arith.constant 0 : i32
    %11 = arith.cmpi ne, %10, %c0_i32_7 : i32
    scf.if %11 {
      %c0_8 = arith.constant 0 : index
      %c0_9 = arith.constant 0 : index
      %12 = vector.load %arg4[%c0_8, %c0_9] : memref<8x1xf32, #tpu.memory_space<vmem>>, vector<8x1xf32>
      %cst_10 = arith.constant 3.906250e-03 : f32
      %13 = vector.broadcast %cst_10 : f32 to vector<8x1xf32>
      %14 = arith.mulf %12, %13 : vector<8x1xf32>
      %c0_11 = arith.constant 0 : index
      %c0_12 = arith.constant 0 : index
      %15 = vector.load %arg3[%c0_11, %c0_12] : memref<8x1xf32, #tpu.memory_space<vmem>>, vector<8x1xf32>
      tpu.vector_store %arg3[%c0_11, %c0_12], %14 {strides = array<i32>} : memref<8x1xf32, #tpu.memory_space<vmem>>, vector<8x1xf32>,
    } else {
    }
    return
  }
  func.func @transform_0(%arg0: i32, %arg1: i32) -> (i32, i32) {
    %c0_i32 = arith.constant 0 : i32
    return %arg0, %arg1 : i32, i32
  }
  func.func @transform_1(%arg0: i32, %arg1: i32) -> (i32, i32) {
    %c0_i32 = arith.constant 0 : i32
    %c0_i32_0 = arith.constant 0 : i32
    return %arg0, %c0_i32 : i32, i32
  }
}

</mosaic_0001>

<bundles_post_ra>
// kernel: tpu_custom_call.1
= control target key start
LH: loop header
LB: loop body
LE: loop exit
PB: predicated region body
PF: predicated region fallthrough
CT: control target
= control target key end

     0   :  { %6 = vsyncpa [#allocation4], 0  ;;  %s76_s9 = smov [#allocation3]   ;;  %s94_s0 = inlined_call_operand.hbm [shape: f32[8,256], index: 0, kind: input, shape index: {}]   ;;  %s95_s1 = inlined_call_operand.vmem [shape: f32[8,1], index: 1, kind: output, shape index: {}]  }
   0x1   :  { %s12_s8 = sshll.u32 %s94_s0, 4  ;;  %s14_s10 = sshll.u32 %s76_s9, 4  ;;  %s13_s8 = int_to_ptr.hbm [resolvable:$true] %s12_s8  ;;  %s15_s10 = int_to_ptr.vmem [resolvable:$true] %s14_s10 }
   0x2   :  { %17 = dma.hbm_to_vmem [thread:$0]  %s13_s8, 256, %s15_s10, [#allocation4]  }
   0x3   :  { %74 = dma.done.wait [#allocation4], 256  }
   0x4   :  { %75 = vsyncadd [#allocation4], 4294967040  ;;  %vm26_vm0 = vcmask 7168   ;;  %v77_v0 = vmov 0.0   ;;  %v28_v1 = vld [vmem:[#allocation3] sm:$0xff]  ;;  %v29_v2 = vld [vmem:[#allocation3 + $0x8] sm:$0xff] }
   0x5   :  { %27 = vst.msk [vmem:[#allocation2] sm:$0xff] %vm26_vm0, %v77_v0  ;;  %v30_v3 = vadd.f32 %v29_v2, %v28_v1 }
   0x7   :  { %31 = vadd.xlane.f32.xlu0 %v30_v3 }
   0xc   :  { %v33_v4 = vld [vmem:[#allocation2] sm:$0xff] }
  0x7a   :  { %v32_v5 = vpop.xlane.xlu0 %31 }
  0x7b   :  { %v34_v6 = vadd.f32 %v33_v4, %v32_v5 }
  0x7d   :  { %36 = vst.msk [vmem:[#allocation2] sm:$0xff] %vm26_vm0, %v34_v6 }
  0x84   :  { %v40_v7 = vld [vmem:[#allocation2] sm:$0xff] }
  0x85   :  { %v41_v8 = vmul.f32 0.00390625, %v40_v7 }
  0x87   :  { %42 = vst.msk [vmem:[%s95_s1] sm:$0xff] %vm26_vm0, %v41_v8 }
  0x88   :  { %47 = vsyncpa [#allocation4], 1 }

</bundles_post_ra>
